<compile_context>
chip_gen: v7x
topology: tpu7x:2x2x1
jax: 0.10.0
libtpu: 0.0.40
codegen_flags: <defaults>
</compile_context>

<pallas_src>
import functools

import jax
import jax.numpy as jnp
from jax.experimental import pallas as pl
from jax.experimental.pallas import tpu as pltpu

LANE = 128


def _round_up(a, b):
    return ((a + b - 1) // b) * b


def _tpu_tuning():
    """Per-generation knobs: (#TensorCores sharing the grid, vmem limit bytes)."""
    kind = ""
    try:
        dev = jax.devices()[0]
        if dev.platform == "tpu":
            kind = dev.device_kind.lower()
    except Exception:
        pass
    if "7" in kind:
        # v7x: 2 TensorCores / chip, 64 MiB VMEM -> stay within the 32 MiB scope.
        return 2, 32 * 1024 * 1024
    # v5e / v6e: 1 TensorCore / chip, 128 MiB VMEM -> roomier scoped limit.
    return 1, 64 * 1024 * 1024


# ----------------------------------------------------------------------------
# Kernels
# ----------------------------------------------------------------------------
def _gap_single_step_kernel(x_ref, o_ref, *, inv_hw):
    # Whole reduction in one block: no scratch, no mask.
    x = x_ref[...].astype(jnp.float32)
    o_ref[...] = (jnp.sum(x, axis=-1, keepdims=True) * inv_hw).astype(o_ref.dtype)


def _gap_multi_step_kernel(x_ref, o_ref, acc_ref, *, hw, tile_hw, inv_hw, ragged):
    # x_ref: (tile_rows, tile_hw) block, tile_hw % 128 == 0.
    # acc_ref: (tile_rows, 128) f32 lane-dense accumulator, resident across HW axis.
    k = pl.program_id(1)
    last = pl.num_programs(1) - 1
    n_rows = x_ref.shape[0]
    n_blk = tile_hw // LANE

    @pl.when(k == 0)
    def _():
        acc_ref[...] = jnp.zeros_like(acc_ref)

    x = x_ref[...].astype(jnp.float32)

    def lane_partial(v):
        # Fold the reduction onto the 128-lane groups: pure VPU vadds,
        # no per-step XLU cross-lane reduce, no narrow (rows, 1) RMW.
        return v.reshape(n_rows, n_blk, LANE).sum(axis=1)

    if ragged:
        # Mask only on the last (ragged) tile; all other steps are unmasked.
        @pl.when(k != last)
        def _():
            acc_ref[...] += lane_partial(x)

        @pl.when(k == last)
        def _():
            lane = jax.lax.broadcasted_iota(jnp.int32, x.shape, 1)
            acc_ref[...] += lane_partial(
                jnp.where(k * tile_hw + lane < hw, x, 0.0))
    else:
        acc_ref[...] += lane_partial(x)

    @pl.when(k == last)
    def _():
        # Single cross-lane reduce + one multiply by the compile-time 1/HW.
        o_ref[...] = (
            jnp.sum(acc_ref[...], axis=-1, keepdims=True) * inv_hw
        ).astype(o_ref.dtype)


# ----------------------------------------------------------------------------
# Wrapper
# ----------------------------------------------------------------------------
def global_avg_pool2d(x):
    """x: (N, C, H, W) -> (N, C, 1, 1); mean over H, W (full-size avg_pool2d)."""
    N, C, H, W = x.shape
    rows = N * C
    hw = H * W
    dtype_bytes = jnp.dtype(x.dtype).itemsize

    # Tiny, non-lane-aligned reductions: lane utilization collapses and the
    # Pallas per-call overhead exceeds a fused XLA reduce.
    if hw < LANE or rows == 0:
        return jnp.mean(x, axis=(2, 3), keepdims=True).astype(x.dtype)

    x2d = x.reshape(rows, hw)  # contiguous reshape; reduction on the lane axis

    num_cores, vmem_limit = _tpu_tuning()
    sublane = 8 * max(1, 4 // dtype_bytes)      # 8 f32 / 16 bf16 / 32 int8
    PER_BLOCK_BUDGET = 8 * 1024 * 1024          # one input buffer (x2 pipelined)
    ROW_CAP = 2048                              # keeps lane-padded out/acc small
    BASE_HW_TILE = 16384                        # multiple of 128

    rows_padded = _round_up(rows, sublane)

    # ---- HW (reduction) tile -------------------------------------------------
    # Adaptive: when rows are few, let the lane chunk grow so the input block
    # stays near the budget instead of producing sub-MiB, overhead-dominated DMAs.
    row_guess = min(rows_padded, ROW_CAP)
    hw_cap = max(BASE_HW_TILE,
                 (PER_BLOCK_BUDGET // (row_guess * dtype_bytes)) // LANE * LANE)

    if hw <= hw_cap:
        single = True
        ragged = False
        tile_hw = hw                       # whole reduction in one step
        tile_hw_pad = _round_up(hw, LANE)  # padded footprint for budgeting
    else:
        single = False
        # Prefer a 128-multiple tile that divides hw exactly -> no mask at all.
        tile_hw = 0
        if hw % LANE == 0:
            t = (hw_cap // LANE) * LANE
            while t >= LANE:
                if hw % t == 0:
                    tile_hw = t
                    break
                t -= LANE
        if tile_hw >= max(hw_cap // 2, 4096):
            ragged = False                 # exact divisor, large enough tiles
        else:
            tile_hw = min(hw_cap, _round_up(hw, LANE))
            ragged = (hw % tile_hw != 0)   # mask applied on the last step only
        tile_hw_pad = tile_hw

    # ---- Row tile --------------------------------------------------------------
    budget_rows = max(
        sublane,
        (PER_BLOCK_BUDGET // (tile_hw_pad * dtype_bytes)) // sublane * sublane)
    tile_rows = min(budget_rows, ROW_CAP, rows_padded)
    if num_cores > 1 and rows_padded > sublane:
        # Only on multi-TensorCore chips (v7x): give the "parallel" axis >= 2 steps.
        per_core = _round_up(-(-rows_padded // num_cores), sublane)
        tile_rows = min(tile_rows, per_core)

    # Lane-padding-aware VMEM safety check (double-buffered in/out + accumulator).
    def _footprint(tr):
        inp = 2 * tr * tile_hw_pad * dtype_bytes
        outp = 2 * tr * LANE * dtype_bytes          # (tr, 1) pads to 128 lanes
        acc = 0 if single else tr * LANE * 4
        return inp + outp + acc

    while tile_rows > sublane and _footprint(tile_rows) > vmem_limit - (2 << 20):
        tile_rows = max(sublane, (tile_rows // 2) // sublane * sublane)

    inv_hw = 1.0 / float(hw)
    cost = pl.CostEstimate(
        flops=rows * hw,
        transcendentals=0,
        bytes_accessed=rows * hw * dtype_bytes + rows * dtype_bytes,
    )

    if single:
        out2d = pl.pallas_call(
            functools.partial(_gap_single_step_kernel, inv_hw=inv_hw),
            out_shape=jax.ShapeDtypeStruct((rows, 1), x.dtype),
            grid_spec=pltpu.PrefetchScalarGridSpec(
                num_scalar_prefetch=0,
                grid=(pl.cdiv(rows, tile_rows),),
                in_specs=[pl.BlockSpec((tile_rows, hw), lambda i: (i, 0))],
                out_specs=pl.BlockSpec((tile_rows, 1), lambda i: (i, 0)),
            ),
            compiler_params=pltpu.CompilerParams(
                dimension_semantics=("parallel",),
                vmem_limit_bytes=vmem_limit,
            ),
            cost_estimate=cost,
        )(x2d)
    else:
        out2d = pl.pallas_call(
            functools.partial(_gap_multi_step_kernel, hw=hw, tile_hw=tile_hw,
                              inv_hw=inv_hw, ragged=ragged),
            out_shape=jax.ShapeDtypeStruct((rows, 1), x.dtype),
            grid_spec=pltpu.PrefetchScalarGridSpec(
                num_scalar_prefetch=0,
                grid=(pl.cdiv(rows, tile_rows), pl.cdiv(hw, tile_hw)),
                in_specs=[pl.BlockSpec((tile_rows, tile_hw), lambda i, k: (i, k))],
                out_specs=pl.BlockSpec((tile_rows, 1), lambda i, k: (i, 0)),
                scratch_shapes=[pltpu.VMEM((tile_rows, LANE), jnp.float32)],
            ),
            compiler_params=pltpu.CompilerParams(
                dimension_semantics=("parallel", "arbitrary"),
                vmem_limit_bytes=vmem_limit,
            ),
            cost_estimate=cost,
        )(x2d)

    return out2d.reshape(N, C, 1, 1)


if __name__ == "__main__":
    key = jax.random.PRNGKey(0)

    # Small shape consistent with the module: N=2, C=4, H=W=16 (single-step path).
    x = jax.random.normal(key, (2, 4, 16, 16), dtype=jnp.float32)
    out = jax.block_until_ready(global_avg_pool2d(x))
    ref = jnp.mean(x, axis=(2, 3), keepdims=True)
    assert out.shape == (2, 4, 1, 1), out.shape
    assert out.dtype == x.dtype, out.dtype
    assert jnp.allclose(out, ref, atol=1e-5, rtol=1e-5)

    # Exercise the multi-step path with a ragged last HW tile
    # (rows=128, hw=129*129=16641 > one 16384-lane tile, 16641 % 128 != 0).
    x2 = jax.random.normal(jax.random.PRNGKey(1), (2, 64, 129, 129),
                           dtype=jnp.float32)
    out2 = jax.block_until_ready(global_avg_pool2d(x2))
    ref2 = jnp.mean(x2, axis=(2, 3), keepdims=True)
    assert out2.shape == (2, 64, 1, 1), out2.shape
    assert jnp.allclose(out2, ref2, atol=1e-5, rtol=1e-4)

    print("KERNEL_OK")
</pallas_src>

<mosaic_0001>
module attributes {stable_mosaic.version = 11 : i64} {
  func.func @_gap_single_step_kernel(%arg0: i32, %arg1: memref<8x256xf32, #tpu.memory_space<vmem>>, %arg2: memref<8x1xf32, #tpu.memory_space<vmem>>) attributes {dimension_semantics = [#tpu.dimension_semantics<parallel>], iteration_bounds = array<i64: 1>, scalar_prefetch = 0 : i64, scratch_operands = 0 : i64, tpu.core_type = #tpu.core_type<tc>, window_params = [{transform_indices = @transform_0, window_bounds = array<i64: 8, 256>}, {transform_indices = @transform_1, window_bounds = array<i64: 8, 1>}]} {
    %c0 = arith.constant 0 : index
    %c0_0 = arith.constant 0 : index
    %0 = vector.load %arg1[%c0, %c0_0] : memref<8x256xf32, #tpu.memory_space<vmem>>, vector<8x256xf32>
    %cst = arith.constant dense<0.000000e+00> : vector<8xf32>
    %1 = vector.multi_reduction <add>, %0, %cst [1] : vector<8x256xf32> to vector<8xf32>
    %2 = vector.shape_cast %1 : vector<8xf32> to vector<8x1xf32>
    %cst_1 = arith.constant 3.906250e-03 : f32
    %3 = vector.broadcast %cst_1 : f32 to vector<8x1xf32>
    %4 = arith.mulf %2, %3 : vector<8x1xf32>
    %c0_2 = arith.constant 0 : index
    %c0_3 = arith.constant 0 : index
    %5 = vector.load %arg2[%c0_2, %c0_3] : memref<8x1xf32, #tpu.memory_space<vmem>>, vector<8x1xf32>
    tpu.vector_store %arg2[%c0_2, %c0_3], %4 {strides = array<i32>} : memref<8x1xf32, #tpu.memory_space<vmem>>, vector<8x1xf32>,
    return
  }
  func.func @transform_0(%arg0: i32) -> (i32, i32) {
    %c0_i32 = arith.constant 0 : i32
    %c0_i32_0 = arith.constant 0 : i32
    return %arg0, %c0_i32 : i32, i32
  }
  func.func @transform_1(%arg0: i32) -> (i32, i32) {
    %c0_i32 = arith.constant 0 : i32
    %c0_i32_0 = arith.constant 0 : i32
    return %arg0, %c0_i32 : i32, i32
  }
}

</mosaic_0001>

<bundles_post_ra>
// kernel: tpu_custom_call.1
= control target key start
LH: loop header
LB: loop body
LE: loop exit
PB: predicated region body
PF: predicated region fallthrough
CT: control target
= control target key end

     0   :  { %6 = vsyncpa [#allocation3], 0  ;;  %s130_s0 = inlined_call_operand.hbm [shape: f32[8,256], index: 0, kind: input, shape index: {}]   ;;  %s131_s1 = inlined_call_operand.hbm [shape: f32[8,1], index: 1, kind: output, shape index: {}]  }
   0x1   :  { %7 = vsyncpa [#allocation4], 0  ;;  %s94_s6 = smov [#allocation2]   ;;  %s46_s10 = scalar_lea.hbm %s130_s0, 256 }
   0x2   :  { %s14_s7 = sshll.u32 %s94_s6, 4  ;;  %p47_p0 = scmp.ne.s32.totalorder %s130_s0, %s46_s10  ;;  %s15_s7 = int_to_ptr.vmem [resolvable:$true] %s14_s7 }
   0x3   :  { %p50_p1 = scmp.lt.u32.totalorder %s46_s10, %s130_s0 }
   0x5   :  { %p52_p2 = pnand %p50_p1, %p47_p0 }
   0x7   :  { %55 = shalt.err (!%p52_p2)
}
   0x8   :  { %s56_s15 = scalar_lea.vmem %s15_s7, 256  ;;  %p61_p4 = scmp.lt.s32.totalorder %s15_s7, %s15_s7 }
   0x9   :  { %p57_p3 = scmp.ne.s32.totalorder %s15_s7, %s56_s15  ;;  %p62_p5 = scmp.lt.s32.totalorder %s56_s15, %s56_s15 }
   0xb   :  { %p63_p6 = por %p62_p5, %p61_p4 }
   0xd   :  { %p64_p7 = pnand %p63_p6, %p57_p3 }
   0xf   :  { %67 = shalt.err (!%p64_p7)
}
  0x10   :  { %17 = dma.hbm_to_vmem [thread:$0]  %s130_s0, 256, %s15_s7, [#allocation3]  }
  0x11   :  { %90 = dma.done.wait [#allocation3], 256  }
  0x12   :  { %91 = vsyncadd [#allocation3], 4294967040  ;;  %v21_v0 = vld [vmem:[#allocation2] sm:$0xff]  ;;  %v22_v1 = vld [vmem:[#allocation2 + $0x8] sm:$0xff]  ;;  %s95_s18 = smov [#allocation5]   ;;  %vm27_vm0 = vcmask 7168  }
  0x13   :  { %v23_v2 = vadd.f32 %v22_v1, %v21_v0  ;;  %s35_s19 = sshll.u32 %s95_s18, 4  ;;  %s36_s19 = int_to_ptr.vmem [resolvable:$true] %s35_s19 }
  0x14   :  { %s68_s20 = scalar_lea.vmem %s36_s19, 128  ;;  %p73_p9 = scmp.lt.s32.totalorder %s36_s19, %s36_s19 }
  0x15   :  { %24 = vadd.xlane.f32.xlu0 %v23_v2  ;;  %p69_p8 = scmp.ne.s32.totalorder %s36_s19, %s68_s20  ;;  %p74_p10 = scmp.lt.s32.totalorder %s68_s20, %s68_s20 }
  0x17   :  { %p75_p11 = por %p74_p10, %p73_p9 }
  0x19   :  { %p76_p12 = pnand %p75_p11, %p69_p8 }
  0xa2   :  { %v25_v3 = vpop.xlane.xlu0 %24 }
  0xa3   :  { %v26_v4 = vmul.f32 0.00390625, %v25_v3 }
  0xa5   :  { %28 = vst.msk [vmem:[#allocation5] sm:$0xff] %vm27_vm0, %v26_v4 }
  0xa6   :  { %79 = shalt.err (!%p76_p12)
}
  0xa7   :  { %s80_s22 = scalar_lea.hbm %s131_s1, 128 }
  0xa8   :  { %p81_p13 = scmp.ne.s32.totalorder %s131_s1, %s80_s22  ;;  %p84_p0 = scmp.lt.u32.totalorder %s80_s22, %s131_s1 }
  0xaa   :  { %p86_p1 = pnand %p84_p0, %p81_p13 }
  0xac   :  { %89 = shalt.err (!%p86_p1)
}
  0xad   :  { %38 = dma.vmem_to_hbm [thread:$0]  %s36_s19, 128, %s131_s1, [#allocation4]  }
  0xae   :  { %92 = dma.done.wait [#allocation4], 128  }
  0xaf   :  { %93 = vsyncadd [#allocation4], 4294967168 }
  0xb0   :  { %42 = vsyncpa [#allocation3], 1 }
  0xb1   :  { %43 = vsyncpa [#allocation4], 1 }

</bundles_post_ra>
